<compile_context>
chip_gen: v7x
topology: tpu7x:2x2x1
jax: 0.10.0
libtpu: 0.0.40
codegen_flags: <defaults>
</compile_context>

<pallas_src>
import functools
import math

import jax
import jax.numpy as jnp
from jax.experimental import pallas as pl
from jax.experimental.pallas import tpu as pltpu

C_LDA = -3.0 / 4.0 * math.pow(3.0 / math.pi, 1.0 / 3.0)
CS = 1.0 / (2.0 * (3.0 * math.pi ** 2.0) ** (1.0 / 3.0))
LOG_CS = math.log(CS)

TL_MAX = 8192  # grid points per step (lane tile width); sweepable 4096-16384
VMEM_LIMIT_BYTES = 48 * 1024 * 1024  # explicit scoped-VMEM limit (safe on v7x's 64 MiB)


def _elu(x):
    # ELU(alpha=1): x if x > 0 else exp(x) - 1.
    # exp of a large positive x may be +inf, but it is always discarded by the select,
    # so no NaN can form; the minimum() clamp is unnecessary VPU work.
    return jnp.where(x > 0, x, jnp.exp(x) - 1.0)


def _round_up(n, m):
    return ((n + m - 1) // m) * m


def dnn_kernel(x_ref,
               w1_ref, b1_ref, w2_ref, b2_ref, w3_ref, b3_ref,
               w4_ref, b4_ref, w5_ref, b5_ref,
               o_ref):
    # x_ref: (3, TL); rows = (rho_up, rho_dn, |grad rho|), points along lanes.
    x = x_ref[...]
    rho0 = x[0:1, :]                       # (1, TL)
    rho1 = x[1:2, :]
    gmod = x[2:3, :]

    rho_t = rho0 + rho1
    lr = jnp.log(rho_t)                    # log(rho_total)            (1 EUP log)
    f0 = lr * (1.0 / 3.0)                  # log(rho_total^(1/3))
    xi = (rho0 - rho1) / rho_t
    f1 = xi * xi
    f2 = LOG_CS + jnp.log(gmod) - (4.0 / 3.0) * lr   # log(s)          (1 EUP log)
    rho13 = jnp.exp(f0)                    # rho_total^(1/3)           (1 EUP exp)
    rho43 = rho_t * rho13                  # rho_total^(4/3), reused for the final scale
    chi = 0.5 * ((1.0 + xi) ** (4.0 / 3.0) + (1.0 - xi) ** (4.0 / 3.0))
    scale = C_LDA * rho43 * chi            # (1, TL)

    # Layer 1 as an outer-product sum (a K=3 matmul would be degenerate on the MXU).
    w1 = w1_ref[...]                       # (80, 3), f32
    h = (w1[:, 0:1] * f0 + w1[:, 1:2] * f1 + w1[:, 2:3] * f2) + b1_ref[...]
    h = _elu(h)                            # (80, TL), f32

    # Layers 2-5 on the MXU. Matmul operand dtype follows the weight dtype chosen on the
    # wrapper side (bf16 fast path / f32 exact path); accumulation is always f32.
    mm_dtype = w2_ref.dtype
    h = _elu(jnp.dot(w2_ref[...], h.astype(mm_dtype),
                     preferred_element_type=jnp.float32) + b2_ref[...])
    h = _elu(jnp.dot(w3_ref[...], h.astype(mm_dtype),
                     preferred_element_type=jnp.float32) + b3_ref[...])
    h = _elu(jnp.dot(w4_ref[...], h.astype(mm_dtype),
                     preferred_element_type=jnp.float32) + b4_ref[...])
    exc = jnp.dot(w5_ref[...], h.astype(mm_dtype),
                  preferred_element_type=jnp.float32) + b5_ref[...]  # (1, TL)

    # TODO(synk): bf16 exp inside _elu (v6e/v7x EUP) is a further ~1.5-2x once matmuls are
    # bf16, but is left disabled pending per-generation tolerance validation.
    o_ref[...] = scale * exc               # lane-dense (1, TL) store


def init_params(key):
    """Deterministic init matching torch.nn.Linear, stored in kernel layout (out, in)."""
    dims = [(3, 80), (80, 80), (80, 80), (80, 80), (80, 1)]
    params = []
    for (fan_in, fan_out) in dims:
        key, kw, kb = jax.random.split(key, 3)
        bound = 1.0 / math.sqrt(fan_in)
        w = jax.random.uniform(kw, (fan_out, fan_in), jnp.float32, -bound, bound)
        b = jax.random.uniform(kb, (fan_out, 1), jnp.float32, -bound, bound)
        params.append((w, b))
    return params


def _choose_tiling(n):
    """Pick lane tile TL and padded N so large N gets >=2 (even) parallel grid steps (v7x)."""
    if n <= 256:
        tl = _round_up(max(n, 1), 128)
        return tl, tl
    tl = min(TL_MAX, _round_up(-(-n // 2), 128))
    n_pad = _round_up(n, tl)
    steps = n_pad // tl
    if steps % 2:
        n_pad += tl   # even step count so both v7x TensorCores get equal work
    return tl, n_pad


def _dnn_forward_impl(rho_b, w1, b1, w2, b2, w3, b3, w4, b4, w5, b5, use_bf16=True):
    n = rho_b.shape[0]
    tl, n_pad = _choose_tiling(n)

    xt = rho_b.astype(jnp.float32).T              # (3, n): points along lanes
    if n_pad != n:
        # benign positive padding so log / div stay finite in padded lanes (discarded below)
        xt = jnp.pad(xt, ((0, 0), (0, n_pad - n)), constant_values=1.0)

    mm_dtype = jnp.bfloat16 if use_bf16 else jnp.float32
    # Only the MXU operands go bf16; layer-1 weights, biases and all elementwise math stay f32
    # (v5e has no bf16 VPU/EUP, and biases feed the f32 accumulate directly).
    weights = (w1, b1,
               w2.astype(mm_dtype), b2,
               w3.astype(mm_dtype), b3,
               w4.astype(mm_dtype), b4,
               w5.astype(mm_dtype), b5)
    weight_specs = [pl.BlockSpec(w.shape, lambda i: (0, 0)) for w in weights]

    # Advisory cost estimate: per point ~2*(3*80 + 3*80*80 + 80) MACs, ~331 transcendentals
    # (2 log + 1 exp features, ~4 for the chi powers, 4*80 ELU exps).
    weight_bytes = sum(int(w.size) * int(w.dtype.itemsize) for w in weights)
    cost = pl.CostEstimate(
        flops=int(n_pad) * (2 * (3 * 80 + 3 * 80 * 80 + 80) + 64),
        transcendentals=int(n_pad) * (3 + 4 + 4 * 80),
        bytes_accessed=16 * int(n_pad) + weight_bytes,
    )

    out = pl.pallas_call(
        dnn_kernel,
        out_shape=jax.ShapeDtypeStruct((1, n_pad), jnp.float32),
        grid_spec=pltpu.PrefetchScalarGridSpec(
            num_scalar_prefetch=0,
            grid=(n_pad // tl,),
            in_specs=[pl.BlockSpec((3, tl), lambda i: (0, i))] + weight_specs,
            out_specs=pl.BlockSpec((1, tl), lambda i: (0, i)),
        ),
        compiler_params=pltpu.CompilerParams(
            dimension_semantics=("parallel",),
            vmem_limit_bytes=VMEM_LIMIT_BYTES,
        ),
        cost_estimate=cost,
    )(xt, *weights)
    return out[:, :n].T                           # (n, 1), matching the PyTorch output


dnn_forward = jax.jit(_dnn_forward_impl, static_argnames=("use_bf16",))


def dnn_reference(rho_b, params):
    """Pure-JAX reference following the PyTorch forward literally (f32 throughout)."""
    rho0, rho1, gmod = rho_b[:, 0], rho_b[:, 1], rho_b[:, 2]
    rho_total = rho0 + rho1
    rho_unif = rho_total ** (1.0 / 3.0)
    xi = (rho0 - rho1) / rho_total
    chi = 0.5 * ((1.0 + xi) ** (4.0 / 3.0) + (1.0 - xi) ** (4.0 / 3.0))
    s = CS * gmod / rho_total ** (4.0 / 3.0)
    inp = jnp.stack([jnp.log(rho_unif), xi ** 2.0, jnp.log(s)], axis=1)

    h = inp
    for (w, b) in params[:-1]:
        h = _elu(h @ w.T + b[:, 0])
    w5, b5 = params[-1]
    exc = h @ w5.T + b5[:, 0]
    return C_LDA * (rho_total ** (4.0 / 3.0) * chi)[:, None] * exc


# TODO(synk): getVxc (autograd-based functional derivative) is not part of the forward
# pass and is not implemented here.

if __name__ == "__main__":
    key = jax.random.PRNGKey(0)
    key_p, key_x = jax.random.split(key)
    params = init_params(key_p)

    # small deterministic input: 8 grid points, strictly positive densities / gradients
    n = 8
    k0, k1, k2 = jax.random.split(key_x, 3)
    rho_up = jax.random.uniform(k0, (n,), jnp.float32, 0.1, 2.0)
    rho_dn = jax.random.uniform(k1, (n,), jnp.float32, 0.1, 2.0)
    mod_drho = jax.random.uniform(k2, (n,), jnp.float32, 0.1, 2.0)
    rho_b = jnp.stack([rho_up, rho_dn, mod_drho], axis=1)  # (8, 3)

    flat = [t for wb in params for t in wb]
    ref = dnn_reference(rho_b, params)

    # Exact (f32 matmul) path: tight check proving the kernel structure matches the module.
    out_f32 = jax.block_until_ready(dnn_forward(rho_b, *flat, use_bf16=False))
    assert out_f32.shape == (n, 1)
    assert jnp.allclose(out_f32, ref, rtol=1e-3, atol=1e-4), (out_f32, ref)

    # Fast (bf16 MXU operand) default path: tolerance sized for bf16 operand rounding
    # (~4e-3 per element over K=80, four layers deep).
    out_fast = jax.block_until_ready(dnn_forward(rho_b, *flat, use_bf16=True))
    assert out_fast.shape == (n, 1)
    assert jnp.allclose(out_fast, ref, rtol=2.5e-2, atol=1e-2), (out_fast, ref)

    print("KERNEL_OK")
</pallas_src>

<mosaic_0001>
module attributes {stable_mosaic.version = 11 : i64} {
  func.func @dnn_kernel(%arg0: i32, %arg1: memref<3x128xf32, #tpu.memory_space<vmem>>, %arg2: memref<80x3xf32, #tpu.memory_space<vmem>>, %arg3: memref<80x1xf32, #tpu.memory_space<vmem>>, %arg4: memref<80x80xf32, #tpu.memory_space<vmem>>, %arg5: memref<80x1xf32, #tpu.memory_space<vmem>>, %arg6: memref<80x80xf32, #tpu.memory_space<vmem>>, %arg7: memref<80x1xf32, #tpu.memory_space<vmem>>, %arg8: memref<80x80xf32, #tpu.memory_space<vmem>>, %arg9: memref<80x1xf32, #tpu.memory_space<vmem>>, %arg10: memref<1x80xf32, #tpu.memory_space<vmem>>, %arg11: memref<1x1xf32, #tpu.memory_space<vmem>>, %arg12: memref<1x128xf32, #tpu.memory_space<vmem>>) attributes {dimension_semantics = [#tpu.dimension_semantics<parallel>], iteration_bounds = array<i64: 1>, scalar_prefetch = 0 : i64, scratch_operands = 0 : i64, tpu.core_type = #tpu.core_type<tc>, window_params = [{transform_indices = @transform_0, window_bounds = array<i64: 3, 128>}, {pipeline_mode = #tpu.pipeline_mode<synchronous>, transform_indices = @transform_1, window_bounds = array<i64: 80, 3>}, {pipeline_mode = #tpu.pipeline_mode<synchronous>, transform_indices = @transform_2, window_bounds = array<i64: 80, 1>}, {pipeline_mode = #tpu.pipeline_mode<synchronous>, transform_indices = @transform_3, window_bounds = array<i64: 80, 80>}, {pipeline_mode = #tpu.pipeline_mode<synchronous>, transform_indices = @transform_4, window_bounds = array<i64: 80, 1>}, {pipeline_mode = #tpu.pipeline_mode<synchronous>, transform_indices = @transform_5, window_bounds = array<i64: 80, 80>}, {pipeline_mode = #tpu.pipeline_mode<synchronous>, transform_indices = @transform_6, window_bounds = array<i64: 80, 1>}, {pipeline_mode = #tpu.pipeline_mode<synchronous>, transform_indices = @transform_7, window_bounds = array<i64: 80, 80>}, {pipeline_mode = #tpu.pipeline_mode<synchronous>, transform_indices = @transform_8, window_bounds = array<i64: 80, 1>}, {pipeline_mode = #tpu.pipeline_mode<synchronous>, transform_indices = @transform_9, window_bounds = array<i64: 1, 80>}, {pipeline_mode = #tpu.pipeline_mode<synchronous>, transform_indices = @transform_10, window_bounds = array<i64: 1, 1>}, {transform_indices = @transform_11, window_bounds = array<i64: 1, 128>}]} {
    %c0 = arith.constant 0 : index
    %c0_0 = arith.constant 0 : index
    %0 = vector.load %arg1[%c0, %c0_0] : memref<3x128xf32, #tpu.memory_space<vmem>>, vector<3x128xf32>
    %1 = vector.extract_strided_slice %0 {offsets = [0, 0], sizes = [1, 128], strides = [1, 1]} : vector<3x128xf32> to vector<1x128xf32>
    %2 = vector.extract_strided_slice %0 {offsets = [1, 0], sizes = [1, 128], strides = [1, 1]} : vector<3x128xf32> to vector<1x128xf32>
    %3 = vector.extract_strided_slice %0 {offsets = [2, 0], sizes = [1, 128], strides = [1, 1]} : vector<3x128xf32> to vector<1x128xf32>
    %4 = arith.addf %1, %2 : vector<1x128xf32>
    %5 = math.log %4 : vector<1x128xf32>
    %cst = arith.constant 0.333333343 : f32
    %6 = vector.broadcast %cst : f32 to vector<1x128xf32>
    %7 = arith.mulf %5, %6 : vector<1x128xf32>
    %8 = arith.subf %1, %2 : vector<1x128xf32>
    %9 = arith.divf %8, %4 : vector<1x128xf32>
    %10 = arith.mulf %9, %9 : vector<1x128xf32>
    %11 = math.log %3 : vector<1x128xf32>
    %cst_1 = arith.constant -1.82250452 : f32
    %12 = vector.broadcast %cst_1 : f32 to vector<1x128xf32>
    %13 = arith.addf %12, %11 : vector<1x128xf32>
    %cst_2 = arith.constant 1.33333337 : f32
    %14 = vector.broadcast %cst_2 : f32 to vector<1x128xf32>
    %15 = arith.mulf %14, %5 : vector<1x128xf32>
    %16 = arith.subf %13, %15 : vector<1x128xf32>
    %17 = math.exp %7 : vector<1x128xf32>
    %18 = arith.mulf %4, %17 : vector<1x128xf32>
    %cst_3 = arith.constant 1.000000e+00 : f32
    %19 = vector.broadcast %cst_3 : f32 to vector<1x128xf32>
    %20 = arith.addf %19, %9 : vector<1x128xf32>
    %cst_4 = arith.constant 1.33333337 : f32
    %21 = vector.broadcast %cst_4 : f32 to vector<1x128xf32>
    %22 = math.powf %20, %21 : vector<1x128xf32>
    %cst_5 = arith.constant 1.000000e+00 : f32
    %23 = vector.broadcast %cst_5 : f32 to vector<1x128xf32>
    %24 = arith.subf %23, %9 : vector<1x128xf32>
    %cst_6 = arith.constant 1.33333337 : f32
    %25 = vector.broadcast %cst_6 : f32 to vector<1x128xf32>
    %26 = math.powf %24, %25 : vector<1x128xf32>
    %27 = arith.addf %22, %26 : vector<1x128xf32>
    %cst_7 = arith.constant 5.000000e-01 : f32
    %28 = vector.broadcast %cst_7 : f32 to vector<1x128xf32>
    %29 = arith.mulf %28, %27 : vector<1x128xf32>
    %cst_8 = arith.constant -0.738558769 : f32
    %30 = vector.broadcast %cst_8 : f32 to vector<1x128xf32>
    %31 = arith.mulf %30, %18 : vector<1x128xf32>
    %32 = arith.mulf %31, %29 : vector<1x128xf32>
    %c0_9 = arith.constant 0 : index
    %c0_10 = arith.constant 0 : index
    %33 = vector.load %arg2[%c0_9, %c0_10] : memref<80x3xf32, #tpu.memory_space<vmem>>, vector<80x3xf32>
    %34 = vector.extract_strided_slice %33 {offsets = [0, 0], sizes = [80, 1], strides = [1, 1]} : vector<80x3xf32> to vector<80x1xf32>
    %35 = vector.broadcast %34 : vector<80x1xf32> to vector<80x128xf32>
    %36 = vector.broadcast %7 : vector<1x128xf32> to vector<80x128xf32>
    %37 = arith.mulf %35, %36 : vector<80x128xf32>
    %38 = vector.extract_strided_slice %33 {offsets = [0, 1], sizes = [80, 1], strides = [1, 1]} : vector<80x3xf32> to vector<80x1xf32>
    %39 = vector.broadcast %38 : vector<80x1xf32> to vector<80x128xf32>
    %40 = vector.broadcast %10 : vector<1x128xf32> to vector<80x128xf32>
    %41 = arith.mulf %39, %40 : vector<80x128xf32>
    %42 = arith.addf %37, %41 : vector<80x128xf32>
    %43 = vector.extract_strided_slice %33 {offsets = [0, 2], sizes = [80, 1], strides = [1, 1]} : vector<80x3xf32> to vector<80x1xf32>
    %44 = vector.broadcast %43 : vector<80x1xf32> to vector<80x128xf32>
    %45 = vector.broadcast %16 : vector<1x128xf32> to vector<80x128xf32>
    %46 = arith.mulf %44, %45 : vector<80x128xf32>
    %47 = arith.addf %42, %46 : vector<80x128xf32>
    %c0_11 = arith.constant 0 : index
    %c0_12 = arith.constant 0 : index
    %48 = vector.load %arg3[%c0_11, %c0_12] : memref<80x1xf32, #tpu.memory_space<vmem>>, vector<80x1xf32>
    %49 = vector.broadcast %48 : vector<80x1xf32> to vector<80x128xf32>
    %50 = arith.addf %47, %49 : vector<80x128xf32>
    %cst_13 = arith.constant 0.000000e+00 : f32
    %51 = vector.broadcast %cst_13 : f32 to vector<80x128xf32>
    %52 = arith.cmpf ogt, %50, %51 : vector<80x128xf32>
    %53 = math.exp %50 : vector<80x128xf32>
    %cst_14 = arith.constant 1.000000e+00 : f32
    %54 = vector.broadcast %cst_14 : f32 to vector<80x128xf32>
    %55 = arith.subf %53, %54 : vector<80x128xf32>
    %56 = arith.select %52, %50, %55 : vector<80x128xi1>, vector<80x128xf32>
    %c0_15 = arith.constant 0 : index
    %c0_16 = arith.constant 0 : index
    %57 = vector.load %arg4[%c0_15, %c0_16] : memref<80x80xf32, #tpu.memory_space<vmem>>, vector<80x80xf32>
    %cst_17 = arith.constant dense<0.000000e+00> : vector<80x128xf32>
    %58 = tpu.matmul %57, %56, %cst_17 {dimension_numbers = #tpu.dot_dimension_numbers<[1], [0], [0], [1], [0, 0, 1, 1], [], []>} : vector<80x80xf32>, vector<80x128xf32>, vector<80x128xf32> -> vector<80x128xf32>
    %c0_18 = arith.constant 0 : index
    %c0_19 = arith.constant 0 : index
    %59 = vector.load %arg5[%c0_18, %c0_19] : memref<80x1xf32, #tpu.memory_space<vmem>>, vector<80x1xf32>
    %60 = vector.broadcast %59 : vector<80x1xf32> to vector<80x128xf32>
    %61 = arith.addf %58, %60 : vector<80x128xf32>
    %cst_20 = arith.constant 0.000000e+00 : f32
    %62 = vector.broadcast %cst_20 : f32 to vector<80x128xf32>
    %63 = arith.cmpf ogt, %61, %62 : vector<80x128xf32>
    %64 = math.exp %61 : vector<80x128xf32>
    %cst_21 = arith.constant 1.000000e+00 : f32
    %65 = vector.broadcast %cst_21 : f32 to vector<80x128xf32>
    %66 = arith.subf %64, %65 : vector<80x128xf32>
    %67 = arith.select %63, %61, %66 : vector<80x128xi1>, vector<80x128xf32>
    %c0_22 = arith.constant 0 : index
    %c0_23 = arith.constant 0 : index
    %68 = vector.load %arg6[%c0_22, %c0_23] : memref<80x80xf32, #tpu.memory_space<vmem>>, vector<80x80xf32>
    %cst_24 = arith.constant dense<0.000000e+00> : vector<80x128xf32>
    %69 = tpu.matmul %68, %67, %cst_24 {dimension_numbers = #tpu.dot_dimension_numbers<[1], [0], [0], [1], [0, 0, 1, 1], [], []>} : vector<80x80xf32>, vector<80x128xf32>, vector<80x128xf32> -> vector<80x128xf32>
    %c0_25 = arith.constant 0 : index
    %c0_26 = arith.constant 0 : index
    %70 = vector.load %arg7[%c0_25, %c0_26] : memref<80x1xf32, #tpu.memory_space<vmem>>, vector<80x1xf32>
    %71 = vector.broadcast %70 : vector<80x1xf32> to vector<80x128xf32>
    %72 = arith.addf %69, %71 : vector<80x128xf32>
    %cst_27 = arith.constant 0.000000e+00 : f32
    %73 = vector.broadcast %cst_27 : f32 to vector<80x128xf32>
    %74 = arith.cmpf ogt, %72, %73 : vector<80x128xf32>
    %75 = math.exp %72 : vector<80x128xf32>
    %cst_28 = arith.constant 1.000000e+00 : f32
    %76 = vector.broadcast %cst_28 : f32 to vector<80x128xf32>
    %77 = arith.subf %75, %76 : vector<80x128xf32>
    %78 = arith.select %74, %72, %77 : vector<80x128xi1>, vector<80x128xf32>
    %c0_29 = arith.constant 0 : index
    %c0_30 = arith.constant 0 : index
    %79 = vector.load %arg8[%c0_29, %c0_30] : memref<80x80xf32, #tpu.memory_space<vmem>>, vector<80x80xf32>
    %cst_31 = arith.constant dense<0.000000e+00> : vector<80x128xf32>
    %80 = tpu.matmul %79, %78, %cst_31 {dimension_numbers = #tpu.dot_dimension_numbers<[1], [0], [0], [1], [0, 0, 1, 1], [], []>} : vector<80x80xf32>, vector<80x128xf32>, vector<80x128xf32> -> vector<80x128xf32>
    %c0_32 = arith.constant 0 : index
    %c0_33 = arith.constant 0 : index
    %81 = vector.load %arg9[%c0_32, %c0_33] : memref<80x1xf32, #tpu.memory_space<vmem>>, vector<80x1xf32>
    %82 = vector.broadcast %81 : vector<80x1xf32> to vector<80x128xf32>
    %83 = arith.addf %80, %82 : vector<80x128xf32>
    %cst_34 = arith.constant 0.000000e+00 : f32
    %84 = vector.broadcast %cst_34 : f32 to vector<80x128xf32>
    %85 = arith.cmpf ogt, %83, %84 : vector<80x128xf32>
    %86 = math.exp %83 : vector<80x128xf32>
    %cst_35 = arith.constant 1.000000e+00 : f32
    %87 = vector.broadcast %cst_35 : f32 to vector<80x128xf32>
    %88 = arith.subf %86, %87 : vector<80x128xf32>
    %89 = arith.select %85, %83, %88 : vector<80x128xi1>, vector<80x128xf32>
    %c0_36 = arith.constant 0 : index
    %c0_37 = arith.constant 0 : index
    %90 = vector.load %arg10[%c0_36, %c0_37] : memref<1x80xf32, #tpu.memory_space<vmem>>, vector<1x80xf32>
    %cst_38 = arith.constant dense<0.000000e+00> : vector<1x128xf32>
    %91 = tpu.matmul %90, %89, %cst_38 {dimension_numbers = #tpu.dot_dimension_numbers<[1], [0], [0], [1], [0, 0, 1, 1], [], []>} : vector<1x80xf32>, vector<80x128xf32>, vector<1x128xf32> -> vector<1x128xf32>
    %c0_39 = arith.constant 0 : index
    %c0_40 = arith.constant 0 : index
    %92 = vector.load %arg11[%c0_39, %c0_40] : memref<1x1xf32, #tpu.memory_space<vmem>>, vector<1x1xf32>
    %93 = vector.broadcast %92 : vector<1x1xf32> to vector<1x128xf32>
    %94 = arith.addf %91, %93 : vector<1x128xf32>
    %95 = arith.mulf %32, %94 : vector<1x128xf32>
    %c0_41 = arith.constant 0 : index
    %c0_42 = arith.constant 0 : index
    %96 = vector.load %arg12[%c0_41, %c0_42] : memref<1x128xf32, #tpu.memory_space<vmem>>, vector<1x128xf32>
    tpu.vector_store %arg12[%c0_41, %c0_42], %95 {strides = array<i32>} : memref<1x128xf32, #tpu.memory_space<vmem>>, vector<1x128xf32>,
    return
  }
  func.func @transform_0(%arg0: i32) -> (i32, i32) {
    %c0_i32 = arith.constant 0 : i32
    %c0_i32_0 = arith.constant 0 : i32
    return %c0_i32, %arg0 : i32, i32
  }
  func.func @transform_1(%arg0: i32) -> (i32, i32) {
    %c0_i32 = arith.constant 0 : i32
    %c0_i32_0 = arith.constant 0 : i32
    %c0_i32_1 = arith.constant 0 : i32
    return %c0_i32, %c0_i32_0 : i32, i32
  }
  func.func @transform_2(%arg0: i32) -> (i32, i32) {
    %c0_i32 = arith.constant 0 : i32
    %c0_i32_0 = arith.constant 0 : i32
    %c0_i32_1 = arith.constant 0 : i32
    return %c0_i32, %c0_i32_0 : i32, i32
  }
  func.func @transform_3(%arg0: i32) -> (i32, i32) {
    %c0_i32 = arith.constant 0 : i32
    %c0_i32_0 = arith.constant 0 : i32
    %c0_i32_1 = arith.constant 0 : i32
    return %c0_i32, %c0_i32_0 : i32, i32
  }
  func.func @transform_4(%arg0: i32) -> (i32, i32) {
    %c0_i32 = arith.constant 0 : i32
    %c0_i32_0 = arith.constant 0 : i32
    %c0_i32_1 = arith.constant 0 : i32
    return %c0_i32, %c0_i32_0 : i32, i32
  }
  func.func @transform_5(%arg0: i32) -> (i32, i32) {
    %c0_i32 = arith.constant 0 : i32
    %c0_i32_0 = arith.constant 0 : i32
    %c0_i32_1 = arith.constant 0 : i32
    return %c0_i32, %c0_i32_0 : i32, i32
  }
  func.func @transform_6(%arg0: i32) -> (i32, i32) {
    %c0_i32 = arith.constant 0 : i32
    %c0_i32_0 = arith.constant 0 : i32
    %c0_i32_1 = arith.constant 0 : i32
    return %c0_i32, %c0_i32_0 : i32, i32
  }
  func.func @transform_7(%arg0: i32) -> (i32, i32) {
    %c0_i32 = arith.constant 0 : i32
    %c0_i32_0 = arith.constant 0 : i32
    %c0_i32_1 = arith.constant 0 : i32
    return %c0_i32, %c0_i32_0 : i32, i32
  }
  func.func @transform_8(%arg0: i32) -> (i32, i32) {
    %c0_i32 = arith.constant 0 : i32
    %c0_i32_0 = arith.constant 0 : i32
    %c0_i32_1 = arith.constant 0 : i32
    return %c0_i32, %c0_i32_0 : i32, i32
  }
  func.func @transform_9(%arg0: i32) -> (i32, i32) {
    %c0_i32 = arith.constant 0 : i32
    %c0_i32_0 = arith.constant 0 : i32
    %c0_i32_1 = arith.constant 0 : i32
    return %c0_i32, %c0_i32_0 : i32, i32
  }
  func.func @transform_10(%arg0: i32) -> (i32, i32) {
    %c0_i32 = arith.constant 0 : i32
    %c0_i32_0 = arith.constant 0 : i32
    %c0_i32_1 = arith.constant 0 : i32
    return %c0_i32, %c0_i32_0 : i32, i32
  }
  func.func @transform_11(%arg0: i32) -> (i32, i32) {
    %c0_i32 = arith.constant 0 : i32
    %c0_i32_0 = arith.constant 0 : i32
    return %c0_i32, %arg0 : i32, i32
  }
}

</mosaic_0001>

<bundles_post_ra>
// kernel: _dnn_forward_impl.1
= control target key start
LH: loop header
LB: loop body
LE: loop exit
PB: predicated region body
PF: predicated region fallthrough
CT: control target
= control target key end

     0   :  { %v1782_v0 = vmov 2   ;;  %v1783_v1 = vmov 1   ;;  %v1784_v7 = vmov 0   ;;  %vm463_vm0 = vcmask 654336   ;;  %s2230_s1 = inlined_call_operand.vmem [shape: f32[80,3], index: 1, kind: input, shape index: {}]   ;;  %s2231_s2 = inlined_call_operand.vmem [shape: f32[80,1], index: 2, kind: input, shape index: {}]   ;;  %s2232_s10 = inlined_call_operand.<no memory space> [shape: f32[1,1], index: 10, kind: input, shape index: {}]   ;;  %s2233_s4 = inlined_call_operand.vmem [shape: f32[80,1], index: 4, kind: input, shape index: {}]   ;;  %s2234_s6 = inlined_call_operand.vmem [shape: f32[80,1], index: 6, kind: input, shape index: {}]   ;;  %s2235_s8 = inlined_call_operand.vmem [shape: f32[80,1], index: 8, kind: input, shape index: {}]   ;;  %s2236_s0 = inlined_call_operand.vmem [shape: f32[3,128], index: 0, kind: input, shape index: {}]   ;;  %s2237_s3 = inlined_call_operand.vmem [shape: f32[80,80], index: 3, kind: input, shape index: {}]   ;;  %s2238_s5 = inlined_call_operand.vmem [shape: f32[80,80], index: 5, kind: input, shape index: {}]   ;;  %s2239_s7 = inlined_call_operand.vmem [shape: f32[80,80], index: 7, kind: input, shape index: {}]   ;;  %s2240_s9 = inlined_call_operand.vmem [shape: f32[1,80], index: 9, kind: input, shape index: {}]   ;;  %s2241_s11 = inlined_call_operand.vmem [shape: f32[1,128], index: 11, kind: output, shape index: {}]  }
   0x1   :  { %1669 = vset.pattern.permute.xlu0 %v1782_v0  ;;  %1668 = vset.pattern.permute.xlu1 %v1783_v1  ;;  %v71_v2 = vld [vmem:[%s2230_s1] sm:$0xff]  ;;  %v73_v3 = vld [vmem:[%s2230_s1 + $0x10] sm:$0xff]  ;;  %v72_v4 = vld [vmem:[%s2230_s1 + $0x8] sm:$0xff]  ;;  %v16_v13 = vstv %s2232_s10  ;;  %v131_v59 = vlaneseq }
   0x2   :  { %210 = vperm.xlu0 %1669, %v71_v2   ;;  %146 = vperm.xlu1 %1668, %v71_v2   ;;  %v76_v5 = vld [vmem:[%s2230_s1 + $0x28] sm:$0xff]  ;;  %v75_v6 = vld [vmem:[%s2230_s1 + $0x20] sm:$0xff]  ;;  %v78_v8 = vld [vmem:[%s2230_s1 + $0x38] sm:$0xff]  ;;  %17 = vst [vmem:[#allocation2] sm:$0x1] %v16_v13 }
   0x3   :  { %v1875_v9 = vld [vmem:[%s2230_s1 + $0x48] sm:$0xff]  ;;  %v74_v10 = vld [vmem:[%s2230_s1 + $0x18] sm:$0xff]  ;;  %v273_v11 = vld [vmem:[%s2231_s2] sm:$0xff] }
   0x4   :  { %v274_v12 = vld [vmem:[%s2231_s2 + $0x8] sm:$0xff]  ;;  %v77_v14 = vld [vmem:[%s2230_s1 + $0x30] sm:$0xff]  ;;  %v277_v15 = vld [vmem:[%s2231_s2 + $0x20] sm:$0xff] }
   0x5   :  { %v279_v16 = vld [vmem:[%s2231_s2 + $0x30] sm:$0xff]  ;;  %v282_v18 = vld [vmem:[%s2231_s2 + $0x48] sm:$0xff]  ;;  %v276_v19 = vld [vmem:[%s2231_s2 + $0x18] sm:$0xff] }
   0x6   :  { %218 = vperm.xlu0 %1669, %v73_v3   ;;  %150 = vperm.xlu1 %1668, %v72_v4   ;;  %v275_v17 = vld [vmem:[%s2231_s2 + $0x10] sm:$0xff]  ;;  %v404_v20 = vld [vmem:[%s2233_s4 + $0x8] sm:$0xff]  ;;  %v406_v21 = vld [vmem:[%s2233_s4 + $0x18] sm:$0xff] }
   0x7   :  { %v408_v22 = vld [vmem:[%s2233_s4 + $0x28] sm:$0xff]  ;;  %v410_v23 = vld [vmem:[%s2233_s4 + $0x38] sm:$0xff]  ;;  %v79_v28 = vld [vmem:[%s2230_s1 + $0x40] sm:$0xff] }
   0x8   :  { %v412_v24 = vld [vmem:[%s2233_s4 + $0x48] sm:$0xff]  ;;  %v672_v27 = vld [vmem:[%s2234_s6 + $0x18] sm:$0xff]  ;;  %v281_v36 = vld [vmem:[%s2231_s2 + $0x40] sm:$0xff] }
   0x9   :  { %v670_v25 = vld [vmem:[%s2234_s6 + $0x8] sm:$0xff]  ;;  %v676_v30 = vld [vmem:[%s2234_s6 + $0x38] sm:$0xff]  ;;  %v403_v38 = vld [vmem:[%s2233_s4] sm:$0xff] }
   0xa   :  { %230 = vperm.xlu0 %1669, %v76_v5   ;;  %1670 = vset.pattern.permute.xlu1 %v1782_v0  ;;  %v278_v26 = vld [vmem:[%s2231_s2 + $0x28] sm:$0xff]  ;;  %v937_v33 = vld [vmem:[%s2235_s8 + $0x18] sm:$0xff]  ;;  %v40_v39 = vld [vmem:[%s2236_s0] sm:$0x7] }
   0xb   :  { %214 = vperm.xlu1 %1670, %v72_v4   ;;  %v674_v29 = vld [vmem:[%s2234_s6 + $0x28] sm:$0xff]  ;;  %v280_v34 = vld [vmem:[%s2231_s2 + $0x38] sm:$0xff]  ;;  %v405_v41 = vld [vmem:[%s2233_s4 + $0x10] sm:$0xff]  ;;  %v42_v42 = vrot.slane %v40_v39, 1 }
   0xc   :  { %v678_v31 = vld [vmem:[%s2234_s6 + $0x48] sm:$0xff]  ;;  %v941_v37 = vld [vmem:[%s2235_s8 + $0x38] sm:$0xff]  ;;  %v407_v43 = vld [vmem:[%s2233_s4 + $0x20] sm:$0xff] }
   0xd   :  { %v935_v32 = vld [vmem:[%s2235_s8 + $0x8] sm:$0xff]  ;;  %v1991_v44 = vadd.f32 %v42_v42, %v40_v39  ;;  %v409_v45 = vld [vmem:[%s2233_s4 + $0x30] sm:$0xff]  ;;  %v411_v48 = vld [vmem:[%s2233_s4 + $0x40] sm:$0xff]  ;;  %v48_v60 = vsub.f32 %v40_v39, %v42_v42 }
   0xe   :  { %1677 = vset.pattern.permute.xlu0 %v1783_v1  ;;  %v939_v35 = vld [vmem:[%s2235_s8 + $0x28] sm:$0xff]  ;;  %v669_v51 = vld [vmem:[%s2234_s6] sm:$0xff]  ;;  %v671_v55 = vld [vmem:[%s2234_s6 + $0x10] sm:$0xff] }
   0xf   :  { %162 = vperm.xlu0 %1677, %v75_v6   ;;  %1671 = vset.pattern.permute.xlu1 %v1784_v7  ;;  %v943_v40 = vld [vmem:[%s2235_s8 + $0x48] sm:$0xff]  ;;  %1686 = vlog2.f32 %v1991_v44  ;;  %v393_v52 = vld [vmem:[%s2237_s3] sm:$0xff] }
  0x10   :  { %93 = vperm.xlu1 %1671, %v73_v3   ;;  %1688 = vlog2.f32 %v40_v39  ;;  %1441 = vmatprep.mubr.msk.f32.mxu0 %vm463_vm0, %v393_v52  ;;  %v673_v62 = vld [vmem:[%s2234_s6 + $0x20] sm:$0xff] }
  0x11   :  { %1690 = vrcp.f32 %v1991_v44 }
  0x13   :  { %174 = vperm.xlu0 %1677, %v78_v8  }
  0x14   :  { %1672 = vset.pattern.permute.xlu1 %v1783_v1 }
  0x15   :  { %154 = vperm.xlu1 %1672, %v73_v3   ;;  %v132_v3 = vshrl.u32 %v131_v59, 7 }
  0x17   :  { %182 = vperm.xlu0 %1677, %v1875_v9   ;;  %v251_v13 = vsub.s32 2, %v132_v3 }
  0x19   :  { %158 = vperm.xlu1 %1672, %v74_v10   ;;  %v1687_v53 = vpop.eup %1686 }
  0x1a   :  { %v46_v56 = vmul.f32 0.6931472, %v1687_v53  ;;  %v1689_v58 = vpop.eup %1688 }
  0x1b   :  { %1683 = vset.pattern.permute.xlu0 %v1784_v7  ;;  %v1691_v61 = vpop.eup %1690  ;;  %v53_v63 = vmul.f32 0.6931472, %v1689_v58 }
  0x1c   :  { %83 = vperm.xlu0 %1683, %v71_v2  }
  0x1d   :  { %1673 = vset.pattern.permute.xlu1 %v1782_v0 }
  0x1e   :  { %222 = vperm.xlu1 %1673, %v74_v10  }
  0x20   :  { %88 = vperm.xlu0 %1683, %v72_v4   ;;  %v2020_v4 = vmul.f32 %v1691_v61, %v48_v60 }
  0x22   :  { %1674 = vset.pattern.permute.xlu1 %v1784_v7 }
  0x23   :  { %285 = vperm.xlu1 %1674, %v273_v11  }
  0x24   :  { %98 = vperm.xlu0 %1683, %v74_v10   ;;  %v51_v10 = vmul.f32 %v2020_v4, %v2020_v4 }
  0x27   :  { %103 = vperm.xlu1 %1674, %v75_v6  }
  0x28   :  { %290 = vperm.xlu0 %1683, %v274_v12   ;;  %v677_v12 = vld [vmem:[%s2234_s6 + $0x40] sm:$0xff] }
  0x2b   :  { %108 = vperm.xlu1 %1674, %v76_v5  }
  0x2c   :  { %113 = vperm.xlu0 %1683, %v77_v14  }
  0x2f   :  { %1675 = vset.pattern.permute.xlu1 %v1783_v1 }
  0x30   :  { %305 = vperm.xlu0 %1683, %v277_v15   ;;  %166 = vperm.xlu1 %1675, %v76_v5   ;;  %v675_v5 = vld [vmem:[%s2234_s6 + $0x30] sm:$0xff]  ;;  %v2034_v15 = vmul.f32 0.33333334, %v46_v56 }
  0x34   :  { %128 = vperm.xlu0 %1683, %v1875_v9   ;;  %1676 = vset.pattern.permute.xlu1 %v1782_v0 }
  0x35   :  { %226 = vperm.xlu1 %1676, %v75_v6   ;;  %v54_v6 = vadd.f32 -1.8225045, %v53_v63 }
  0x38   :  { %315 = vperm.xlu0 %1683, %v279_v16  }
  0x39   :  { %1678 = vset.pattern.permute.xlu1 %v1784_v7 }
  0x3a   :  { %295 = vperm.xlu1 %1678, %v275_v17  }
  0x3c   :  { %330 = vperm.xlu0 %1683, %v282_v18  }
  0x3e   :  { %300 = vperm.xlu1 %1678, %v276_v19   ;;  %v934_v19 = vld [vmem:[%s2235_s8] sm:$0xff] }
  0x40   :  { %420 = vperm.xlu0 %1683, %v404_v20  }
  0x42   :  { %118 = vperm.xlu1 %1678, %v78_v8  }
  0x44   :  { %430 = vperm.xlu0 %1683, %v406_v21  }
  0x46   :  { %1679 = vset.pattern.permute.xlu1 %v1783_v1 }
  0x47   :  { %170 = vperm.xlu1 %1679, %v77_v14  }
  0x48   :  { %440 = vperm.xlu0 %1683, %v408_v22  }
  0x4b   :  { %1680 = vset.pattern.permute.xlu1 %v1782_v0 }
  0x4c   :  { %450 = vperm.xlu0 %1683, %v410_v23   ;;  %234 = vperm.xlu1 %1680, %v77_v14  }
  0x50   :  { %460 = vperm.xlu0 %1683, %v412_v24   ;;  %238 = vperm.xlu1 %1680, %v78_v8  }
  0x54   :  { %686 = vperm.xlu0 %1683, %v670_v25   ;;  %1681 = vset.pattern.permute.xlu1 %v1784_v7 }
  0x55   :  { %310 = vperm.xlu1 %1681, %v278_v26  }
  0x58   :  { %696 = vperm.xlu0 %1683, %v672_v27   ;;  %v936_v27 = vld [vmem:[%s2235_s8 + $0x10] sm:$0xff] }
  0x59   :  { %123 = vperm.xlu1 %1681, %v79_v28  }
  0x5c   :  { %706 = vperm.xlu0 %1683, %v674_v29  }
  0x5d   :  { %1682 = vset.pattern.permute.xlu1 %v1783_v1 }
  0x5e   :  { %178 = vperm.xlu1 %1682, %v79_v28  }
  0x60   :  { %716 = vperm.xlu0 %1683, %v676_v30  }
  0x62   :  { %1684 = vset.pattern.permute.xlu1 %v1782_v0  ;;  %v55_v0 = vmul.f32 1.3333334, %v46_v56 }
  0x63   :  { %242 = vperm.xlu1 %1684, %v79_v28  }
  0x64   :  { %726 = vperm.xlu0 %1683, %v678_v31  }
  0x67   :  { %246 = vperm.xlu1 %1684, %v1875_v9   ;;  %v2027_v9 = vsub.s32 0, %v132_v3 }
  0x68   :  { %951 = vperm.xlu0 %1683, %v935_v32  }
  0x69   :  { %v2039_v17 = vrot.slane %v51_v10, %v2027_v9  ;;  %v2048_v21 = vrot.slane %v2034_v15, %v2027_v9 }
  0x6b   :  { %1685 = vset.pattern.permute.xlu1 %v1784_v7  ;;  %v57_v7 = vrot.slane %v55_v0, 6 }
  0x6c   :  { %961 = vperm.xlu0 %1683, %v937_v33   ;;  %320 = vperm.xlu1 %1685, %v280_v34   ;;  %v938_v33 = vld [vmem:[%s2235_s8 + $0x20] sm:$0xff] }
  0x6d   :  { %v59_v14 = vsub.f32 %v54_v6, %v57_v7 }
  0x6f   :  { %v2044_v20 = vrot.slane %v59_v14, %v251_v13 }
  0x70   :  { %971 = vperm.xlu0 %1683, %v939_v35   ;;  %325 = vperm.xlu1 %1685, %v281_v36  }
  0x74   :  { %981 = vperm.xlu0 %1683, %v941_v37   ;;  %415 = vperm.xlu1 %1685, %v403_v38  }
  0x78   :  { %991 = vperm.xlu0 %1683, %v943_v40   ;;  %425 = vperm.xlu1 %1685, %v405_v41   ;;  %v940_v40 = vld [vmem:[%s2235_s8 + $0x30] sm:$0xff] }
  0x7c   :  { %435 = vperm.xlu1 %1685, %v407_v43  }
  0x80   :  { %445 = vperm.xlu1 %1685, %v409_v45  }
  0x81   :  { %v147_v46 = vpop.permute.xlu1 %146  ;;  %v211_v47 = vpop.permute.xlu0 %210 }
  0x82   :  { %v189_v23 = vmul.f32 %v2039_v17, %v147_v46  ;;  %v253_v24 = vmul.f32 %v2044_v20, %v211_v47  ;;  %v942_v46 = vld [vmem:[%s2235_s8 + $0x40] sm:$0xff] }
  0x84   :  { %455 = vperm.xlu1 %1685, %v411_v48  }
  0x85   :  { %v151_v49 = vpop.permute.xlu1 %150  ;;  %v2001_v50 = vpop.permute.xlu0 %218 }
  0x86   :  { %v190_v30 = vmul.f32 %v2039_v17, %v151_v49  ;;  %v1190_v49 = vld [vmem:[#allocation2] sm:$0x1]  ;;  %v255_v56 = vmul.f32 %v2044_v20, %v2001_v50 }
  0x88   :  { %681 = vperm.xlu1 %1685, %v669_v51  }
  0x89   :  { %v2010_v54 = vpop.permute.xlu0 %230 }
  0x8a   :  { %v215_v57 = vpop.permute.xlu1 %214 }
  0x8b   :  { %v254_v38 = vmul.f32 %v2044_v20, %v215_v57 }
  0x8c   :  { %691 = vperm.xlu1 %1685, %v671_v55  }
  0x8e   :  { %v2018_v1 = vpop.permute.xlu0 %162 }
  0x8f   :  { %v94_v2 = vpop.permute.xlu1 %93 }
  0x90   :  { %701 = vperm.xlu1 %1685, %v673_v62   ;;  %v137_v55 = vmul.f32 %v2048_v21, %v94_v2 }
  0x92   :  { %v2025_v8 = vpop.permute.xlu0 %174 }
  0x94   :  { %711 = vperm.xlu1 %1685, %v675_v5   ;;  %v155_v11 = vpop.permute.xlu1 %154 }
  0x95   :  { %v191_v52 = vmul.f32 %v2039_v17, %v155_v11 }
  0x96   :  { %v2036_v16 = vpop.permute.xlu0 %182 }
  0x97   :  { %v201_v57 = vadd.f32 %v191_v52, %v137_v55 }
  0x98   :  { %721 = vperm.xlu1 %1685, %v677_v12   ;;  %v159_v18 = vpop.permute.xlu1 %158 }
  0x99   :  { %v192_v62 = vmul.f32 %v2039_v17, %v159_v18  ;;  %v265_v3 = vadd.f32 %v255_v56, %v201_v57 }
  0x9b   :  { %v84_v22 = vpop.permute.xlu0 %83 }
  0x9c   :  { %v135_v25 = vmul.f32 %v2048_v21, %v84_v22  ;;  %946 = vperm.xlu1 %1685, %v934_v19   ;;  %v193_v22 = vmul.f32 %v2039_v17, %v2018_v1  ;;  %v258_v1 = vmul.f32 %v2044_v20, %v2010_v54 }
  0x9d   :  { %v223_v26 = vpop.permute.xlu1 %222 }
  0x9e   :  { %v199_v28 = vadd.f32 %v189_v23, %v135_v25  ;;  %v256_v2 = vmul.f32 %v2044_v20, %v223_v26 }
  0x9f   :  { %v89_v29 = vpop.permute.xlu0 %88 }
  0xa0   :  { %v136_v31 = vmul.f32 %v2048_v21, %v89_v29  ;;  %956 = vperm.xlu1 %1685, %v936_v27   ;;  %v263_v32 = vadd.f32 %v253_v24, %v199_v28 }
  0xa2   :  { %v200_v34 = vadd.f32 %v190_v30, %v136_v31  ;;  %v286_v35 = vpop.permute.xlu1 %285 }
  0xa3   :  { %v333_v36 = vadd.f32 %v286_v35, %v263_v32  ;;  %v99_v37 = vpop.permute.xlu0 %98 }
  0xa4   :  { %966 = vperm.xlu1 %1685, %v938_v33   ;;  %v264_v42 = vadd.f32 %v254_v38, %v200_v34  ;;  %v138_v58 = vmul.f32 %v2048_v21, %v99_v37 }
  0xa5   :  { %v353_v39 = vmul.f32 1.442695, %v333_v36  ;;  %vm343_vm1 = vcmp.gt.f32.partialorder %v333_v36, 0.0 }
  0xa6   :  { %v104_v41 = vpop.permute.xlu1 %103  ;;  %v202_v0 = vadd.f32 %v192_v62, %v138_v58  ;;  %v198_v62 = vmul.f32 %v2039_v17, %v2036_v16 }
  0xa7   :  { %v291_v43 = vpop.permute.xlu0 %290  ;;  %1692 = vpow2.f32 %v353_v39  ;;  %v139_v23 = vmul.f32 %v2048_v21, %v104_v41 }
  0xa8   :  { %v334_v45 = vadd.f32 %v291_v43, %v264_v42  ;;  %976 = vperm.xlu1 %1685, %v940_v40   ;;  %v266_v12 = vadd.f32 %v256_v2, %v202_v0 }
  0xa9   :  { %v203_v27 = vadd.f32 %v193_v22, %v139_v23 }
  0xaa   :  { %v355_v47 = vmul.f32 1.442695, %v334_v45  ;;  %v109_v48 = vpop.permute.xlu1 %108  ;;  %vm344_vm2 = vcmp.gt.f32.partialorder %v334_v45, 0.0 }
  0xab   :  { %v114_v25 = vpop.permute.xlu0 %113  ;;  %v140_v35 = vmul.f32 %v2048_v21, %v109_v48 }
  0xac   :  { %1694 = vpow2.f32 %v355_v47  ;;  %986 = vperm.xlu1 %1685, %v942_v46  }
  0xaf   :  { %v167_v51 = vpop.permute.xlu1 %166  ;;  %v306_v34 = vpop.permute.xlu0 %305 }
  0xb0   :  { %1193 = vperm.xlu1 %1685, %v1190_v49   ;;  %v194_v30 = vmul.f32 %v2039_v17, %v167_v51  ;;  %v141_v51 = vmul.f32 %v2048_v21, %v114_v25 }
  0xb1   :  { %v1693_v53 = vpop.eup %1692 }
  0xb2   :  { %v1279_v60 = vadd.f32 -1.0, %v1693_v53  ;;  %v204_v38 = vadd.f32 %v194_v30, %v140_v35 }
  0xb3   :  { %v129_v53 = vpop.permute.xlu0 %128 }
  0xb4   :  { %v227_v59 = vpop.permute.xlu1 %226  ;;  %v383_v6 = vsel %vm343_vm1, %v333_v36, %v1279_v60 }
  0xb5   :  { %v257_v24 = vmul.f32 %v2044_v20, %v227_v59 }
  0xb6   :  { %v1695_v61 = vpop.eup %1694 }
  0xb7   :  { %v1280_v63 = vadd.f32 -1.0, %v1695_v61  ;;  %v267_v29 = vadd.f32 %v257_v24, %v203_v27  ;;  %v316_v0 = vpop.permute.xlu0 %315 }
  0xb9   :  { %v296_v5 = vpop.permute.xlu1 %295  ;;  %v384_v7 = vsel %vm344_vm2, %v334_v45, %v1280_v63  ;;  %v337_v36 = vadd.f32 %v306_v34, %v267_v29  ;;  %v268_v45 = vadd.f32 %v258_v1, %v204_v38  ;;  %v144_v63 = vmul.f32 %v2048_v21, %v129_v53  ;;  %v400_v53 = vld [vmem:[%s2237_s3 + $0x38] sm:$0xff] }
  0xba   :  { %v335_v10 = vadd.f32 %v296_v5, %v265_v3  ;;  %v1549_v50 = vpack.c.bf16 %v384_v7, %v383_v6  ;;  %v196_v3 = vmul.f32 %v2039_v17, %v2025_v8 }
  0xbb   :  { %v361_v43 = vmul.f32 1.442695, %v337_v36  ;;  %vm347_vm6 = vcmp.gt.f32.partialorder %v337_v36, 0.0 }
  0xbc   :  { %v357_v11 = vmul.f32 1.442695, %v335_v10  ;;  %1550 = vmatprep.subr.bf16.mxu0 %v1549_v50  ;;  %vm345_vm3 = vcmp.gt.f32.partialorder %v335_v10, 0.0 }
  0xbd   :  { %v301_v13 = vpop.permute.xlu1 %300  ;;  %1552 = vmatpush3.bf16.msra.mxu0 %v1549_v50 }
  0xbe   :  { %1696 = vpow2.f32 %v357_v11  ;;  %v336_v14 = vadd.f32 %v301_v13, %v266_v12  ;;  %v208_v12 = vadd.f32 %v198_v62, %v144_v63 }
  0xc0   :  { %v359_v18 = vmul.f32 1.442695, %v336_v14  ;;  %vm346_vm4 = vcmp.gt.f32.partialorder %v336_v14, 0.0 }
  0xc1   :  { %v119_v19 = vpop.permute.xlu1 %118 }
  0xc2   :  { %1698 = vpow2.f32 %v359_v18  ;;  %v142_v5 = vmul.f32 %v2048_v21, %v119_v19  ;;  %v331_v19 = vpop.permute.xlu0 %330 }
  0xc3   :  { %1700 = vpow2.f32 %v361_v43 }
  0xc6   :  { %v171_v26 = vpop.permute.xlu1 %170 }
  0xc7   :  { %v195_v52 = vmul.f32 %v2039_v17, %v171_v26 }
  0xc8   :  { %v1697_v28 = vpop.eup %1696 }
  0xc9   :  { %v1281_v31 = vadd.f32 -1.0, %v1697_v28  ;;  %v205_v56 = vadd.f32 %v195_v52, %v141_v51  ;;  %v397_v51 = vld [vmem:[%s2237_s3 + $0x20] sm:$0xff]  ;;  %v398_v52 = vld [vmem:[%s2237_s3 + $0x28] sm:$0xff] }
  0xcb   :  { %v235_v32 = vpop.permute.xlu1 %234  ;;  %v385_v40 = vsel %vm345_vm3, %v335_v10, %v1281_v31 }
  0xcc   :  { %v1699_v33 = vpop.eup %1698  ;;  %v259_v54 = vmul.f32 %v2044_v20, %v235_v32 }
  0xcd   :  { %v1282_v37 = vadd.f32 -1.0, %v1699_v33  ;;  %v1701_v57 = vpop.eup %1700 }
  0xce   :  { %v269_v58 = vadd.f32 %v259_v54, %v205_v56  ;;  %v1283_v60 = vadd.f32 -1.0, %v1701_v57  ;;  %v399_v54 = vld [vmem:[%s2237_s3 + $0x30] sm:$0xff]  ;;  %v402_v56 = vld [vmem:[%s2237_s3 + $0x48] sm:$0xff]  ;;  %v659_v57 = vld [vmem:[%s2238_s5] sm:$0xff] }
  0xcf   :  { %v239_v39 = vpop.permute.xlu1 %238  ;;  %v386_v41 = vsel %vm346_vm4, %v336_v14, %v1282_v37  ;;  %v206_v14 = vadd.f32 %v196_v3, %v142_v5  ;;  %1476 = vmatprep.mubr.msk.f32.mxu1 %vm463_vm0, %v659_v57 }
  0xd0   :  { %v1553_v42 = vpack.c.bf16 %v386_v41, %v385_v40  ;;  %v339_v6 = vadd.f32 %v316_v0, %v269_v58  ;;  %v260_v2 = vmul.f32 %v2044_v20, %v239_v39  ;;  %v387_v50 = vsel %vm347_vm6, %v337_v36, %v1283_v60  ;;  %v421_v58 = vpop.permute.xlu0 %420 }
  0xd2   :  { %1554 = vmatprep.subr.bf16.mxu0 %v1553_v42  ;;  %v365_v18 = vmul.f32 1.442695, %v339_v6  ;;  %v270_v25 = vadd.f32 %v260_v2, %v206_v14  ;;  %vm349_vm8 = vcmp.gt.f32.partialorder %v339_v6, 0.0 }
  0xd3   :  { %1556 = vmatpush3.bf16.msra.mxu0 %v1553_v42 }
  0xd4   :  { %v311_v46 = vpop.permute.xlu1 %310  ;;  %v431_v60 = vpop.permute.xlu0 %430 }
  0xd5   :  { %v338_v47 = vadd.f32 %v311_v46, %v268_v45 }
  0xd7   :  { %v363_v48 = vmul.f32 1.442695, %v338_v47  ;;  %vm348_vm5 = vcmp.gt.f32.partialorder %v338_v47, 0.0 }
  0xd8   :  { %v124_v49 = vpop.permute.xlu1 %123 }
  0xd9   :  { %1702 = vpow2.f32 %v363_v48  ;;  %v143_v23 = vmul.f32 %v2048_v21, %v124_v49  ;;  %v395_v48 = vld [vmem:[%s2237_s3 + $0x10] sm:$0xff]  ;;  %v396_v49 = vld [vmem:[%s2237_s3 + $0x18] sm:$0xff] }
  0xda   :  { %1704 = vpow2.f32 %v365_v18 }
  0xdd   :  { %v179_v55 = vpop.permute.xlu1 %178 }
  0xde   :  { %v197_v22 = vmul.f32 %v2039_v17, %v179_v55  ;;  %v401_v55 = vld [vmem:[%s2237_s3 + $0x40] sm:$0xff] }
  0xe0   :  { %v207_v28 = vadd.f32 %v197_v22, %v143_v23 }
  0xe2   :  { %v243_v59 = vpop.permute.xlu1 %242 }
  0xe3   :  { %v1703_v61 = vpop.eup %1702  ;;  %v261_v24 = vmul.f32 %v2044_v20, %v243_v59 }
  0xe4   :  { %v1284_v7 = vadd.f32 -1.0, %v1703_v61  ;;  %v1705_v35 = vpop.eup %1704 }
  0xe5   :  { %v271_v32 = vadd.f32 %v261_v24, %v207_v28  ;;  %v1285_v36 = vadd.f32 -1.0, %v1705_v35 }
  0xe6   :  { %v247_v10 = vpop.permute.xlu1 %246  ;;  %v388_v11 = vsel %vm348_vm5, %v338_v47, %v1284_v7  ;;  %v394_v47 = vld [vmem:[%s2237_s3 + $0x8] sm:$0xff] }
  0xe7   :  { %v262_v16 = vmul.f32 %v2044_v20, %v247_v10  ;;  %v1557_v13 = vpack.c.bf16 %v388_v11, %v387_v50  ;;  %v389_v1 = vsel %vm349_vm8, %v339_v6, %v1285_v36  ;;  %v441_v6 = vpop.permute.xlu0 %440 }
  0xe9   :  { %v272_v8 = vadd.f32 %v262_v16, %v208_v12  ;;  %1558 = vmatprep.subr.bf16.mxu0 %v1557_v13 }
  0xea   :  { %1560 = vmatpush3.bf16.msra.mxu0 %v1557_v13 }
  0xeb   :  { %v342_v26 = vadd.f32 %v331_v19, %v272_v8  ;;  %v321_v27 = vpop.permute.xlu1 %320  ;;  %v451_v8 = vpop.permute.xlu0 %450 }
  0xec   :  { %v340_v29 = vadd.f32 %v321_v27, %v270_v25 }
  0xed   :  { %v371_v30 = vmul.f32 1.442695, %v342_v26  ;;  %vm352_vm10 = vcmp.gt.f32.partialorder %v342_v26, 0.0 }
  0xee   :  { %v367_v31 = vmul.f32 1.442695, %v340_v29  ;;  %vm350_vm7 = vcmp.gt.f32.partialorder %v340_v29, 0.0 }
  0xef   :  { %1706 = vpow2.f32 %v371_v30  ;;  %v326_v33 = vpop.permute.xlu1 %325 }
  0xf0   :  { %1708 = vpow2.f32 %v367_v31  ;;  %v341_v17 = vadd.f32 %v326_v33, %v271_v32  ;;  %v461_v33 = vpop.permute.xlu0 %460 }
  0xf2   :  { %v369_v34 = vmul.f32 1.442695, %v341_v17  ;;  %vm351_vm9 = vcmp.gt.f32.partialorder %v341_v17, 0.0 }
  0xf3   :  { %v416_v59 = vpop.permute.xlu1 %415 }
  0xf4   :  { %1710 = vpow2.f32 %v369_v34 }
  0xf7   :  { %v426_v61 = vpop.permute.xlu1 %425 }
  0xf9   :  { %v1707_v21 = vpop.eup %1706 }
  0xfa   :  { %v1709_v20 = vpop.eup %1708  ;;  %v1288_v39 = vadd.f32 -1.0, %v1707_v21 }
  0xfb   :  { %v1286_v37 = vadd.f32 -1.0, %v1709_v20  ;;  %v436_v10 = vpop.permute.xlu1 %435 }
  0xfc   :  { %v392_v45 = vsel %vm352_vm10, %v342_v26, %v1288_v39 }
  0xfd   :  { %v390_v38 = vsel %vm350_vm7, %v340_v29, %v1286_v37 }
  0xfe   :  { %v1711_v40 = vpop.eup %1710  ;;  %v1561_v41 = vpack.c.bf16 %v390_v38, %v389_v1 }
  0xff   :  { %v1287_v42 = vadd.f32 -1.0, %v1711_v40  ;;  %v446_v23 = vpop.permute.xlu1 %445 }
 0x100   :  { %1562 = vmatprep.subr.bf16.mxu0 %v1561_v41 }
 0x101   :  { %1564 = vmatpush3.bf16.msra.mxu0 %v1561_v41  ;;  %v391_v43 = vsel %vm351_vm9, %v341_v17, %v1287_v42 }
 0x102   :  { %v1565_v46 = vpack.c.bf16 %v392_v45, %v391_v43 }
 0x103   :  { %v456_v21 = vpop.permute.xlu1 %455 }
 0x104   :  { %1566 = vmatprep.subr.bf16.mxu0 %v1565_v46 }
 0x105   :  { %1568 = vmatpush3.bf16.msra.mxu0 %v1565_v46 }
 0x108   :  { %1442 = vmatmul.mubr.msk.f32.vlgmr.msra.gmra.mrb[0].mxu0 %vm463_vm0, %v394_v47 }
 0x109   :  { %1444 = vmatprep.mubr.msk.f32.mxu0 %vm463_vm0, %v395_v48 }
 0x10c   :  { %1445 = vmatmul.mubr.msk.f32.gmra.mrb[2].mxu0 %vm463_vm0, %v396_v49 }
 0x10d   :  { %1447 = vmatprep.mubr.msk.f32.mxu0 %vm463_vm0, %v397_v51 }
 0x110   :  { %1448 = vmatmul.mubr.msk.f32.gmra.mrb[4].mxu0 %vm463_vm0, %v398_v52 }
 0x111   :  { %1450 = vmatprep.mubr.msk.f32.mxu0 %vm463_vm0, %v399_v54 }
 0x114   :  { %1451 = vmatmul.mubr.msk.f32.gmra.mrb[6].mxu0 %vm463_vm0, %v400_v53 }
 0x115   :  { %1453 = vmatprep.mubr.msk.f32.mxu0 %vm463_vm0, %v401_v55 }
 0x118   :  { %1454 = vmatmul.mubr.msk.f32.gmra.mrb[8].mxu0 %vm463_vm0, %v402_v56 }
 0x1db   :  { %v1443_v62 = vpop.f32.mrb[0].mxu0 }
 0x1dc   :  { %v566_v63 = vadd.f32 %v1443_v62, %v421_v58  ;;  %v560_v0 = vpop.f32.mrb[1].mxu0 }
 0x1dd   :  { %v561_v3 = vadd.f32 %v560_v0, %v416_v59 }
 0x1de   :  { %v621_v5 = vmul.f32 1.442695, %v566_v63  ;;  %vm610_vm11 = vcmp.gt.f32.partialorder %v566_v63, 0.0 }
 0x1df   :  { %v619_v7 = vmul.f32 1.442695, %v561_v3  ;;  %v1446_v2 = vpop.f32.mrb[2].mxu0  ;;  %vm609_vm12 = vcmp.gt.f32.partialorder %v561_v3, 0.0 }
 0x1e0   :  { %1712 = vpow2.f32 %v621_v5  ;;  %v576_v50 = vadd.f32 %v1446_v2, %v431_v60  ;;  %v570_v11 = vpop.f32.mrb[3].mxu0 }
 0x1e1   :  { %1714 = vpow2.f32 %v619_v7  ;;  %v571_v12 = vadd.f32 %v570_v11, %v426_v61 }
 0x1e2   :  { %v625_v16 = vmul.f32 1.442695, %v576_v50  ;;  %vm612_vm13 = vcmp.gt.f32.partialorder %v576_v50, 0.0 }
 0x1e3   :  { %v623_v13 = vmul.f32 1.442695, %v571_v12  ;;  %v1449_v14 = vpop.f32.mrb[4].mxu0  ;;  %vm611_vm14 = vcmp.gt.f32.partialorder %v571_v12, 0.0 }
 0x1e4   :  { %1716 = vpow2.f32 %v625_v16  ;;  %v586_v18 = vadd.f32 %v1449_v14, %v441_v6  ;;  %v580_v22 = vpop.f32.mrb[5].mxu0  ;;  %v661_v16 = vld [vmem:[%s2238_s5 + $0x10] sm:$0xff]  ;;  %v663_v14 = vld [vmem:[%s2238_s5 + $0x20] sm:$0xff] }
 0x1e5   :  { %1718 = vpow2.f32 %v623_v13  ;;  %v581_v19 = vadd.f32 %v580_v22, %v436_v10  ;;  %v662_v13 = vld [vmem:[%s2238_s5 + $0x18] sm:$0xff]  ;;  %v665_v22 = vld [vmem:[%s2238_s5 + $0x30] sm:$0xff] }
 0x1e6   :  { %v629_v24 = vmul.f32 1.442695, %v586_v18  ;;  %vm614_vm15 = vcmp.gt.f32.partialorder %v586_v18, 0.0 }
 0x1e7   :  { %v627_v25 = vmul.f32 1.442695, %v581_v19  ;;  %v1452_v26 = vpop.f32.mrb[6].mxu0  ;;  %vm613_vm1 = vcmp.gt.f32.partialorder %v581_v19, 0.0 }
 0x1e8   :  { %1720 = vpow2.f32 %v629_v24  ;;  %v596_v27 = vadd.f32 %v1452_v26, %v451_v8  ;;  %v590_v28 = vpop.f32.mrb[7].mxu0  ;;  %v666_v8 = vld [vmem:[%s2238_s5 + $0x38] sm:$0xff]  ;;  %v924_v24 = vld [vmem:[%s2239_s7] sm:$0xff]  ;;  %v682_v26 = vpop.permute.xlu1 %681 }
 0x1e9   :  { %1722 = vpow2.f32 %v627_v25  ;;  %v591_v29 = vadd.f32 %v590_v28, %v446_v23  ;;  %v668_v23 = vld [vmem:[%s2238_s5 + $0x48] sm:$0xff]  ;;  %1511 = vmatprep.mubr.msk.f32.mxu0 %vm463_vm0, %v924_v24  ;;  %v687_v25 = vpop.permute.xlu0 %686 }
 0x1ea   :  { %v1713_v30 = vpop.eup %1712  ;;  %v633_v31 = vmul.f32 1.442695, %v596_v27  ;;  %vm616_vm2 = vcmp.gt.f32.partialorder %v596_v27, 0.0 }
 0x1eb   :  { %v1715_v32 = vpop.eup %1714  ;;  %v631_v17 = vmul.f32 1.442695, %v591_v29  ;;  %v1455_v34 = vpop.f32.mrb[8].mxu0  ;;  %v1300_v35 = vadd.f32 -1.0, %v1713_v30  ;;  %vm615_vm3 = vcmp.gt.f32.partialorder %v591_v29, 0.0 }
 0x1ec   :  { %1724 = vpow2.f32 %v633_v31  ;;  %v606_v36 = vadd.f32 %v1455_v34, %v461_v33  ;;  %v600_v20 = vpop.f32.mrb[9].mxu0  ;;  %v1299_v37 = vadd.f32 -1.0, %v1715_v32  ;;  %v692_v28 = vpop.permute.xlu1 %691 }
 0x1ed   :  { %1726 = vpow2.f32 %v631_v17  ;;  %v601_v1 = vadd.f32 %v600_v20, %v456_v21  ;;  %v650_v38 = vsel %vm610_vm11, %v566_v63, %v1300_v35 }
 0x1ee   :  { %v1717_v39 = vpop.eup %1716  ;;  %v637_v40 = vmul.f32 1.442695, %v606_v36  ;;  %v649_v41 = vsel %vm609_vm12, %v561_v3, %v1299_v37  ;;  %vm618_vm4 = vcmp.gt.f32.partialorder %v606_v36, 0.0 }
 0x1ef   :  { %v1719_v42 = vpop.eup %1718  ;;  %v1302_v43 = vadd.f32 -1.0, %v1717_v39  ;;  %v635_v45 = vmul.f32 1.442695, %v601_v1  ;;  %v1569_v46 = vpack.c.bf16 %v650_v38, %v649_v41  ;;  %vm617_vm5 = vcmp.gt.f32.partialorder %v601_v1, 0.0 }
 0x1f0   :  { %v1301_v47 = vadd.f32 -1.0, %v1719_v42  ;;  %1728 = vpow2.f32 %v637_v40  ;;  %v702_v21 = vpop.permute.xlu1 %701 }
 0x1f1   :  { %1730 = vpow2.f32 %v635_v45  ;;  %1570 = vmatprep.subr.bf16.mxu1 %v1569_v46  ;;  %v652_v48 = vsel %vm612_vm13, %v576_v50, %v1302_v43 }
 0x1f2   :  { %v1721_v49 = vpop.eup %1720  ;;  %1572 = vmatpush3.bf16.msra.mxu1 %v1569_v46  ;;  %v651_v51 = vsel %vm611_vm14, %v571_v12, %v1301_v47  ;;  %v660_v12 = vld [vmem:[%s2238_s5 + $0x8] sm:$0xff] }
 0x1f3   :  { %v1723_v52 = vpop.eup %1722  ;;  %v1304_v54 = vadd.f32 -1.0, %v1721_v49  ;;  %v1573_v53 = vpack.c.bf16 %v652_v48, %v651_v51 }
 0x1f4   :  { %v1303_v55 = vadd.f32 -1.0, %v1723_v52  ;;  %v712_v45 = vpop.permute.xlu1 %711 }
 0x1f5   :  { %1574 = vmatprep.subr.bf16.mxu1 %v1573_v53  ;;  %v654_v56 = vsel %vm614_vm15, %v586_v18, %v1304_v54  ;;  %v664_v18 = vld [vmem:[%s2238_s5 + $0x28] sm:$0xff] }
 0x1f6   :  { %v1725_v57 = vpop.eup %1724  ;;  %1576 = vmatpush3.bf16.msra.mxu1 %v1573_v53  ;;  %v653_v58 = vsel %vm613_vm1, %v581_v19, %v1303_v55  ;;  %v667_v19 = vld [vmem:[%s2238_s5 + $0x40] sm:$0xff]  ;;  %vm1786_vm1 = vmmov 0  }
 0x1f7   :  { %v1727_v59 = vpop.eup %1726  ;;  %v1306_v60 = vadd.f32 -1.0, %v1725_v57  ;;  %v1577_v61 = vpack.c.bf16 %v654_v56, %v653_v58 }
 0x1f8   :  { %v1305_v62 = vadd.f32 -1.0, %v1727_v59 }
 0x1f9   :  { %1578 = vmatprep.subr.bf16.mxu1 %v1577_v61  ;;  %v656_v63 = vsel %vm616_vm2, %v596_v27, %v1306_v60  ;;  %v697_v27 = vpop.permute.xlu0 %696  ;;  %v722_v60 = vpop.permute.xlu1 %721 }
 0x1fa   :  { %v1729_v0 = vpop.eup %1728  ;;  %1580 = vmatpush3.bf16.msra.mxu1 %v1577_v61  ;;  %v655_v3 = vsel %vm615_vm3, %v591_v29, %v1305_v62 }
 0x1fb   :  { %v1731_v5 = vpop.eup %1730  ;;  %v1308_v6 = vadd.f32 -1.0, %v1729_v0  ;;  %v1581_v7 = vpack.c.bf16 %v656_v63, %v655_v3 }
 0x1fc   :  { %v1307_v2 = vadd.f32 -1.0, %v1731_v5 }
 0x1fd   :  { %1582 = vmatprep.subr.bf16.mxu1 %v1581_v7  ;;  %v658_v10 = vsel %vm618_vm4, %v606_v36, %v1308_v6  ;;  %v707_v17 = vpop.permute.xlu0 %706 }
 0x1fe   :  { %1584 = vmatpush3.bf16.msra.mxu1 %v1581_v7  ;;  %v657_v50 = vsel %vm617_vm5, %v601_v1, %v1307_v2 }
 0x1ff   :  { %v1585_v11 = vpack.c.bf16 %v658_v10, %v657_v50 }
 0x201   :  { %1586 = vmatprep.subr.bf16.mxu1 %v1585_v11  ;;  %v717_v42 = vpop.permute.xlu0 %716 }
 0x202   :  { %1588 = vmatpush3.bf16.msra.mxu1 %v1585_v11 }
 0x205   :  { %1477 = vmatmul.mubr.msk.f32.vlgmr.msra.gmra.mrb[0].mxu1 %vm463_vm0, %v660_v12  ;;  %v727_v56 = vpop.permute.xlu0 %726 }
 0x206   :  { %1479 = vmatprep.mubr.msk.f32.mxu1 %vm463_vm0, %v661_v16 }
 0x209   :  { %1480 = vmatmul.mubr.msk.f32.gmra.mrb[2].mxu1 %vm463_vm0, %v662_v13 }
 0x20a   :  { %1482 = vmatprep.mubr.msk.f32.mxu1 %vm463_vm0, %v663_v14 }
 0x20d   :  { %1483 = vmatmul.mubr.msk.f32.gmra.mrb[4].mxu1 %vm463_vm0, %v664_v18 }
 0x20e   :  { %1485 = vmatprep.mubr.msk.f32.mxu1 %vm463_vm0, %v665_v22 }
 0x211   :  { %1486 = vmatmul.mubr.msk.f32.gmra.mrb[6].mxu1 %vm463_vm0, %v666_v8 }
 0x212   :  { %1488 = vmatprep.mubr.msk.f32.mxu1 %vm463_vm0, %v667_v19 }
 0x215   :  { %1489 = vmatmul.mubr.msk.f32.gmra.mrb[8].mxu1 %vm463_vm0, %v668_v23 }
 0x2d8   :  { %v1478_v29 = vpop.f32.mrb[0].mxu1 }
 0x2d9   :  { %v831_v30 = vadd.f32 %v1478_v29, %v687_v25  ;;  %v825_v31 = vpop.f32.mrb[1].mxu1 }
 0x2da   :  { %v826_v32 = vadd.f32 %v825_v31, %v682_v26 }
 0x2db   :  { %v886_v33 = vmul.f32 1.442695, %v831_v30  ;;  %vm875_vm6 = vcmp.gt.f32.partialorder %v831_v30, 0.0 }
 0x2dc   :  { %v884_v34 = vmul.f32 1.442695, %v826_v32  ;;  %v1481_v35 = vpop.f32.mrb[2].mxu1  ;;  %vm874_vm7 = vcmp.gt.f32.partialorder %v826_v32, 0.0 }
 0x2dd   :  { %1732 = vpow2.f32 %v886_v33  ;;  %v841_v36 = vadd.f32 %v1481_v35, %v697_v27  ;;  %v835_v20 = vpop.f32.mrb[3].mxu1 }
 0x2de   :  { %1734 = vpow2.f32 %v884_v34  ;;  %v836_v37 = vadd.f32 %v835_v20, %v692_v28 }
 0x2df   :  { %v890_v1 = vmul.f32 1.442695, %v841_v36  ;;  %vm877_vm8 = vcmp.gt.f32.partialorder %v841_v36, 0.0 }
 0x2e0   :  { %v888_v38 = vmul.f32 1.442695, %v836_v37  ;;  %v1484_v39 = vpop.f32.mrb[4].mxu1  ;;  %vm876_vm9 = vcmp.gt.f32.partialorder %v836_v37, 0.0 }
 0x2e1   :  { %1736 = vpow2.f32 %v890_v1  ;;  %v851_v40 = vadd.f32 %v1484_v39, %v707_v17  ;;  %v845_v41 = vpop.f32.mrb[5].mxu1  ;;  %v926_v1 = vld [vmem:[%s2239_s7 + $0x10] sm:$0xff]  ;;  %v928_v39 = vld [vmem:[%s2239_s7 + $0x20] sm:$0xff] }
 0x2e2   :  { %1738 = vpow2.f32 %v888_v38  ;;  %v846_v43 = vadd.f32 %v845_v41, %v702_v21  ;;  %v927_v38 = vld [vmem:[%s2239_s7 + $0x18] sm:$0xff]  ;;  %v930_v41 = vld [vmem:[%s2239_s7 + $0x30] sm:$0xff] }
 0x2e3   :  { %v894_v46 = vmul.f32 1.442695, %v851_v40  ;;  %vm879_vm10 = vcmp.gt.f32.partialorder %v851_v40, 0.0 }
 0x2e4   :  { %v892_v47 = vmul.f32 1.442695, %v846_v43  ;;  %v1487_v48 = vpop.f32.mrb[6].mxu1  ;;  %vm878_vm11 = vcmp.gt.f32.partialorder %v846_v43, 0.0 }
 0x2e5   :  { %1740 = vpow2.f32 %v894_v46  ;;  %v861_v49 = vadd.f32 %v1487_v48, %v717_v42  ;;  %v855_v51 = vpop.f32.mrb[7].mxu1  ;;  %v931_v42 = vld [vmem:[%s2239_s7 + $0x38] sm:$0xff]  ;;  %v1785_v46 = vmov 0.0|0.0   ;;  %v952_v48 = vpop.permute.xlu0 %951 }
 0x2e6   :  { %1742 = vpow2.f32 %v892_v47  ;;  %v856_v52 = vadd.f32 %v855_v51, %v712_v45  ;;  %v933_v45 = vld [vmem:[%s2239_s7 + $0x48] sm:$0xff]  ;;  %1609 = vmatprep.subr.bf16.mxu1 %v1785_v46  ;;  %v1787_v47 = vmov 0.0  }
 0x2e7   :  { %v1733_v54 = vpop.eup %1732  ;;  %v898_v53 = vmul.f32 1.442695, %v861_v49  ;;  %vm881_vm12 = vcmp.gt.f32.partialorder %v861_v49, 0.0  ;;  %1546 = vmatprep.mubr.msk.f32.mxu1 %vm1786_vm1, %v1787_v47 }
 0x2e8   :  { %v1735_v55 = vpop.eup %1734  ;;  %v1320_v57 = vadd.f32 -1.0, %v1733_v54  ;;  %v896_v58 = vmul.f32 1.442695, %v856_v52  ;;  %v1490_v59 = vpop.f32.mrb[8].mxu1  ;;  %vm880_vm13 = vcmp.gt.f32.partialorder %v856_v52, 0.0 }
 0x2e9   :  { %v1319_v61 = vadd.f32 -1.0, %v1735_v55  ;;  %1744 = vpow2.f32 %v898_v53  ;;  %v871_v62 = vadd.f32 %v1490_v59, %v727_v56  ;;  %v865_v63 = vpop.f32.mrb[9].mxu1  ;;  %v962_v51 = vpop.permute.xlu0 %961 }
 0x2ea   :  { %1746 = vpow2.f32 %v896_v58  ;;  %v866_v0 = vadd.f32 %v865_v63, %v722_v60  ;;  %v915_v3 = vsel %vm875_vm6, %v831_v30, %v1320_v57 }
 0x2eb   :  { %v1737_v5 = vpop.eup %1736  ;;  %v902_v6 = vmul.f32 1.442695, %v871_v62  ;;  %v914_v7 = vsel %vm874_vm7, %v826_v32, %v1319_v61  ;;  %vm883_vm14 = vcmp.gt.f32.partialorder %v871_v62, 0.0 }
 0x2ec   :  { %v1739_v2 = vpop.eup %1738  ;;  %v1322_v10 = vadd.f32 -1.0, %v1737_v5  ;;  %v900_v50 = vmul.f32 1.442695, %v866_v0  ;;  %v1589_v11 = vpack.c.bf16 %v915_v3, %v914_v7  ;;  %vm882_vm15 = vcmp.gt.f32.partialorder %v866_v0, 0.0 }
 0x2ed   :  { %v1321_v12 = vadd.f32 -1.0, %v1739_v2  ;;  %1748 = vpow2.f32 %v902_v6  ;;  %v972_v58 = vpop.permute.xlu0 %971 }
 0x2ee   :  { %1750 = vpow2.f32 %v900_v50  ;;  %1590 = vmatprep.subr.bf16.mxu0 %v1589_v11  ;;  %v917_v16 = vsel %vm877_vm8, %v841_v36, %v1322_v10 }
 0x2ef   :  { %v1741_v13 = vpop.eup %1740  ;;  %1592 = vmatpush3.bf16.msra.mxu0 %v1589_v11  ;;  %v916_v14 = vsel %vm876_vm9, %v836_v37, %v1321_v12  ;;  %v925_v37 = vld [vmem:[%s2239_s7 + $0x8] sm:$0xff] }
 0x2f0   :  { %v1743_v18 = vpop.eup %1742  ;;  %v1324_v22 = vadd.f32 -1.0, %v1741_v13  ;;  %v1593_v8 = vpack.c.bf16 %v917_v16, %v916_v14 }
 0x2f1   :  { %v1323_v19 = vadd.f32 -1.0, %v1743_v18  ;;  %v982_v10 = vpop.permute.xlu0 %981 }
 0x2f2   :  { %1594 = vmatprep.subr.bf16.mxu0 %v1593_v8  ;;  %v919_v23 = vsel %vm879_vm10, %v851_v40, %v1324_v22  ;;  %v929_v40 = vld [vmem:[%s2239_s7 + $0x28] sm:$0xff] }
 0x2f3   :  { %v1745_v24 = vpop.eup %1744  ;;  %1596 = vmatpush3.bf16.msra.mxu0 %v1593_v8  ;;  %v918_v25 = vsel %vm878_vm11, %v846_v43, %v1323_v19  ;;  %v932_v43 = vld [vmem:[%s2239_s7 + $0x40] sm:$0xff] }
 0x2f4   :  { %v1747_v26 = vpop.eup %1746  ;;  %v1326_v27 = vadd.f32 -1.0, %v1745_v24  ;;  %v1597_v28 = vpack.c.bf16 %v919_v23, %v918_v25 }
 0x2f5   :  { %v1325_v29 = vadd.f32 -1.0, %v1747_v26  ;;  %v992_v24 = vpop.permute.xlu0 %991 }
 0x2f6   :  { %1598 = vmatprep.subr.bf16.mxu0 %v1597_v28  ;;  %v921_v30 = vsel %vm881_vm12, %v861_v49, %v1326_v27  ;;  %v947_v49 = vpop.permute.xlu1 %946 }
 0x2f7   :  { %v1749_v31 = vpop.eup %1748  ;;  %1600 = vmatpush3.bf16.msra.mxu0 %v1597_v28  ;;  %v920_v32 = vsel %vm880_vm13, %v856_v52, %v1325_v29 }
 0x2f8   :  { %v1751_v33 = vpop.eup %1750  ;;  %v1328_v17 = vadd.f32 -1.0, %v1749_v31  ;;  %v1601_v34 = vpack.c.bf16 %v921_v30, %v920_v32 }
 0x2f9   :  { %v1327_v35 = vadd.f32 -1.0, %v1751_v33 }
 0x2fa   :  { %1602 = vmatprep.subr.bf16.mxu0 %v1601_v34  ;;  %v923_v21 = vsel %vm883_vm14, %v871_v62, %v1328_v17  ;;  %v957_v52 = vpop.permute.xlu1 %956 }
 0x2fb   :  { %1604 = vmatpush3.bf16.msra.mxu0 %v1601_v34  ;;  %v922_v36 = vsel %vm882_vm15, %v866_v0, %v1327_v35 }
 0x2fc   :  { %v1605_v20 = vpack.c.bf16 %v923_v21, %v922_v36 }
 0x2fe   :  { %1606 = vmatprep.subr.bf16.mxu0 %v1605_v20  ;;  %v967_v61 = vpop.permute.xlu1 %966 }
 0x2ff   :  { %1608 = vmatpush3.bf16.msra.mxu0 %v1605_v20 }
 0x302   :  { %1512 = vmatmul.mubr.msk.f32.vlgmr.msra.gmra.mrb[10].mxu0 %vm463_vm0, %v925_v37  ;;  %v977_v11 = vpop.permute.xlu1 %976 }
 0x303   :  { %1514 = vmatprep.mubr.msk.f32.mxu0 %vm463_vm0, %v926_v1 }
 0x306   :  { %1515 = vmatmul.mubr.msk.f32.gmra.mrb[12].mxu0 %vm463_vm0, %v927_v38  ;;  %v987_v28 = vpop.permute.xlu1 %986 }
 0x307   :  { %1517 = vmatprep.mubr.msk.f32.mxu0 %vm463_vm0, %v928_v39 }
 0x30a   :  { %1518 = vmatmul.mubr.msk.f32.gmra.mrb[14].mxu0 %vm463_vm0, %v929_v40 }
 0x30b   :  { %1520 = vmatprep.mubr.msk.f32.mxu0 %vm463_vm0, %v930_v41 }
 0x30e   :  { %1521 = vmatmul.mubr.msk.f32.gmra.mrb[16].mxu0 %vm463_vm0, %v931_v42 }
 0x30f   :  { %1523 = vmatprep.mubr.msk.f32.mxu0 %vm463_vm0, %v932_v43 }
 0x312   :  { %1524 = vmatmul.mubr.msk.f32.gmra.mrb[18].mxu0 %vm463_vm0, %v933_v45 }
 0x3d5   :  { %v1513_v54 = vpop.f32.mrb[10].mxu0 }
 0x3d6   :  { %v1096_v53 = vadd.f32 %v1513_v54, %v952_v48  ;;  %v1090_v55 = vpop.f32.mrb[11].mxu0 }
 0x3d7   :  { %v1091_v56 = vadd.f32 %v1090_v55, %v947_v49 }
 0x3d8   :  { %v1151_v57 = vmul.f32 1.442695, %v1096_v53  ;;  %vm1140_vm2 = vcmp.gt.f32.partialorder %v1096_v53, 0.0 }
 0x3d9   :  { %v1149_v59 = vmul.f32 1.442695, %v1091_v56  ;;  %v1516_v60 = vpop.f32.mrb[12].mxu0  ;;  %vm1139_vm3 = vcmp.gt.f32.partialorder %v1091_v56, 0.0 }
 0x3da   :  { %1752 = vpow2.f32 %v1151_v57  ;;  %v1106_v62 = vadd.f32 %v1516_v60, %v962_v51  ;;  %v1100_v63 = vpop.f32.mrb[13].mxu0 }
 0x3db   :  { %1754 = vpow2.f32 %v1149_v59  ;;  %v1101_v0 = vadd.f32 %v1100_v63, %v957_v52 }
 0x3dc   :  { %v1155_v3 = vmul.f32 1.442695, %v1106_v62  ;;  %vm1142_vm4 = vcmp.gt.f32.partialorder %v1106_v62, 0.0 }
 0x3dd   :  { %v1153_v5 = vmul.f32 1.442695, %v1101_v0  ;;  %v1519_v6 = vpop.f32.mrb[14].mxu0  ;;  %vm1141_vm5 = vcmp.gt.f32.partialorder %v1101_v0, 0.0 }
 0x3de   :  { %1756 = vpow2.f32 %v1155_v3  ;;  %v1116_v7 = vadd.f32 %v1519_v6, %v972_v58  ;;  %v1110_v2 = vpop.f32.mrb[15].mxu0  ;;  %v1189_v3 = vld [vmem:[%s2240_s9] sm:$0x1]  ;;  %v65_v6 = vsub.f32 1.0, %v2020_v4 }
 0x3df   :  { %1758 = vpow2.f32 %v1153_v5  ;;  %v1111_v50 = vadd.f32 %v1110_v2, %v967_v61  ;;  %v63_v5 = vadd.f32 1.0, %v2020_v4 }
 0x3e0   :  { %v1159_v12 = vmul.f32 1.442695, %v1116_v7  ;;  %vm1144_vm6 = vcmp.gt.f32.partialorder %v1116_v7, 0.0  ;;  %v1645_v2 = vand.u32 2147483647, %v65_v6  ;;  %vm1644_vm1 = vcmp.lt.f32.partialorder %v65_v6, 0.0 }
 0x3e1   :  { %v1157_v16 = vmul.f32 1.442695, %v1111_v50  ;;  %v1522_v13 = vpop.f32.mrb[16].mxu0  ;;  %vm1143_vm7 = vcmp.gt.f32.partialorder %v1111_v50, 0.0  ;;  %vm1625_vm15 = vcmp.lt.f32.partialorder %v63_v5, 0.0 }
 0x3e2   :  { %1760 = vpow2.f32 %v1159_v12  ;;  %v1126_v14 = vadd.f32 %v1522_v13, %v982_v10  ;;  %v1120_v18 = vpop.f32.mrb[17].mxu0  ;;  %v1649_v13 = vand.u32 2147483648, %v65_v6  ;;  %vm1653_vm12 = vweird.f32 %v1645_v2 }
 0x3e3   :  { %1762 = vpow2.f32 %v1157_v16  ;;  %v1121_v22 = vadd.f32 %v1120_v18, %v977_v11  ;;  %v1630_v16 = vand.u32 2147483648, %v63_v5  ;;  %vm1655_vm14 = vcmp.eq.f32.partialorder %v1645_v2, 0.0 }
 0x3e4   :  { %v1753_v8 = vpop.eup %1752  ;;  %v1163_v19 = vmul.f32 1.442695, %v1126_v14  ;;  %vm1146_vm8 = vcmp.gt.f32.partialorder %v1126_v14, 0.0 }
 0x3e5   :  { %v1755_v23 = vpop.eup %1754  ;;  %v1340_v25 = vadd.f32 -1.0, %v1753_v8  ;;  %v1161_v26 = vmul.f32 1.442695, %v1121_v22  ;;  %v1525_v27 = vpop.f32.mrb[18].mxu0  ;;  %vm1145_vm9 = vcmp.gt.f32.partialorder %v1121_v22, 0.0 }
 0x3e6   :  { %v1339_v29 = vadd.f32 -1.0, %v1755_v23  ;;  %1764 = vpow2.f32 %v1163_v19  ;;  %v1136_v30 = vadd.f32 %v1525_v27, %v992_v24  ;;  %v1130_v31 = vpop.f32.mrb[19].mxu0  ;;  %v60_v19 = vmul.f32 1.442695, %v2034_v15 }
 0x3e7   :  { %v1180_v32 = vsel %vm1140_vm2, %v1096_v53, %v1340_v25  ;;  %1766 = vpow2.f32 %v1161_v26  ;;  %v1131_v33 = vadd.f32 %v1130_v31, %v987_v28  ;;  %vm1624_vm2 = vcmp.eq.f32.partialorder %v63_v5, 0.0 }
 0x3e8   :  { %v1757_v17 = vpop.eup %1756  ;;  %v1179_v34 = vsel %vm1139_vm3, %v1091_v56, %v1339_v29  ;;  %v1167_v35 = vmul.f32 1.442695, %v1136_v30  ;;  %vm1148_vm10 = vcmp.gt.f32.partialorder %v1136_v30, 0.0  ;;  %vm1643_vm3 = vcmp.eq.f32.partialorder %v65_v6, 0.0 }
 0x3e9   :  { %v1759_v21 = vpop.eup %1758  ;;  %v1610_v36 = vpack.c.bf16 %v1180_v32, %v1179_v34  ;;  %v1342_v20 = vadd.f32 -1.0, %v1757_v17  ;;  %v1165_v37 = vmul.f32 1.442695, %v1131_v33  ;;  %vm1147_vm11 = vcmp.gt.f32.partialorder %v1131_v33, 0.0 }
 0x3ea   :  { %v1341_v1 = vadd.f32 -1.0, %v1759_v21  ;;  %1768 = vpow2.f32 %v1167_v35  ;;  %v1194_v21 = vpop.permute.xlu1 %1193 }
 0x3eb   :  { %v1182_v38 = vsel %vm1142_vm4, %v1106_v62, %v1342_v20  ;;  %1770 = vpow2.f32 %v1165_v37  ;;  %1611 = vmatpush3.bf16.msra.mxu1 %v1610_v36  ;;  %v1199_v36 = vrot.slane %v1194_v21, %v2027_v9 }
 0x3ec   :  { %v1761_v39 = vpop.eup %1760  ;;  %v1181_v40 = vsel %vm1141_vm5, %v1101_v0, %v1341_v1  ;;  %1612 = vmatprep.subr.bf16.mxu1 %v1785_v46  ;;  %vm1646_vm5 = vcmp.eq.f32.partialorder %v1645_v2, inf }
 0x3ed   :  { %v1763_v41 = vpop.eup %1762  ;;  %v1613_v42 = vpack.c.bf16 %v1182_v38, %v1181_v40  ;;  %v1344_v43 = vadd.f32 -1.0, %v1761_v39 }
 0x3ee   :  { %v1343_v45 = vadd.f32 -1.0, %v1763_v41 }
 0x3ef   :  { %v1184_v47 = vsel %vm1144_vm6, %v1116_v7, %v1344_v43  ;;  %1614 = vmatpush3.bf16.msra.mxu1 %v1613_v42  ;;  %v1626_v7 = vand.u32 2147483647, %v63_v5 }
 0x3f0   :  { %v1765_v48 = vpop.eup %1764  ;;  %v1183_v49 = vsel %vm1143_vm7, %v1111_v50, %v1343_v45  ;;  %1615 = vmatprep.subr.bf16.mxu1 %v1785_v46 }
 0x3f1   :  { %v1767_v51 = vpop.eup %1766  ;;  %v1616_v52 = vpack.c.bf16 %v1184_v47, %v1183_v49  ;;  %v1346_v54 = vadd.f32 -1.0, %v1765_v48  ;;  %1772 = vlog2.f32 %v1626_v7  ;;  %vm1636_vm13 = vcmp.eq.f32.partialorder %v1626_v7, 0.0 }
 0x3f2   :  { %v1345_v53 = vadd.f32 -1.0, %v1767_v51  ;;  %1774 = vlog2.f32 %v1645_v2  ;;  %vm1627_vm4 = vcmp.eq.f32.partialorder %v1626_v7, inf }
 0x3f3   :  { %v1186_v55 = vsel %vm1146_vm8, %v1126_v14, %v1346_v54  ;;  %1617 = vmatpush3.bf16.msra.mxu1 %v1616_v52 }
 0x3f4   :  { %v1769_v56 = vpop.eup %1768  ;;  %v1185_v57 = vsel %vm1145_vm9, %v1121_v22, %v1345_v53  ;;  %1618 = vmatprep.subr.bf16.mxu1 %v1785_v46 }
 0x3f5   :  { %v1771_v58 = vpop.eup %1770  ;;  %v1619_v59 = vpack.c.bf16 %v1186_v55, %v1185_v57  ;;  %v1348_v60 = vadd.f32 -1.0, %v1769_v56 }
 0x3f6   :  { %v1347_v61 = vadd.f32 -1.0, %v1771_v58 }
 0x3f7   :  { %v1188_v62 = vsel %vm1148_vm10, %v1136_v30, %v1348_v60  ;;  %1620 = vmatpush3.bf16.msra.mxu1 %v1619_v59 }
 0x3f8   :  { %v1187_v63 = vsel %vm1147_vm11, %v1131_v33, %v1347_v61  ;;  %1621 = vmatprep.subr.bf16.mxu1 %v1785_v46 }
 0x3f9   :  { %v1622_v0 = vpack.c.bf16 %v1188_v62, %v1187_v63 }
 0x3fb   :  { %1623 = vmatpush3.bf16.msra.mxu1 %v1622_v0  ;;  %v1773_v10 = vpop.eup %1772 }
 0x3fc   :  { %v1775_v50 = vpop.eup %1774  ;;  %v1631_v11 = vmul.f32 0.33333334, %v1773_v10 }
 0x3fd   :  { %v1650_v46 = vmul.f32 0.33333334, %v1775_v50 }
 0x3fe   :  { %1547 = vmatmul.mubr.msk.f32.vlgmr.msra.gmra.mrb[10].mxu1 %vm463_vm0, %v1189_v3  ;;  %1776 = vpow2.f32 %v1631_v11  ;;  %vm1634_vm0 = vweird.f32 %v1626_v7 }
 0x3ff   :  { %1778 = vpow2.f32 %v1650_v46 }
 0x400   :  { %1780 = vpow2.f32 %v60_v19 }
 0x408   :  { %v1777_v12 = vpop.eup %1776 }
 0x409   :  { %v1779_v14 = vpop.eup %1778  ;;  %v1633_v18 = vor.u32 %v1777_v12, %v1630_v16 }
 0x40a   :  { %v1652_v22 = vor.u32 %v1779_v14, %v1649_v13  ;;  %v1781_v31 = vpop.eup %1780 }
 0x40b   :  { %v1635_v8 = vsel %vm1634_vm0, %v63_v5, %v1633_v18  ;;  %v62_v15 = vmul.f32 %v1781_v31, %v1991_v44 }
 0x40c   :  { %v1654_v4 = vsel %vm1653_vm12, %v65_v6, %v1652_v22  ;;  %v1638_v23 = vsel %vm1636_vm13, %v1630_v16, %v1635_v8 }
 0x40d   :  { %v1657_v24 = vsel %vm1655_vm14, %v1649_v13, %v1654_v4  ;;  %v1639_v25 = vmul.f32 %v1638_v23, %v63_v5  ;;  %v69_v35 = vmul.f32 -0.73855877, %v62_v15 }
 0x40e   :  { %v1658_v26 = vmul.f32 %v1657_v24, %v65_v6 }
 0x40f   :  { %v1640_v27 = vsel %vm1625_vm15, nan, %v1639_v25 }
 0x410   :  { %v1659_v28 = vsel %vm1644_vm1, nan, %v1658_v26  ;;  %v1641_v29 = vsel %vm1624_vm2, 0.0, %v1640_v27 }
 0x411   :  { %v1660_v30 = vsel %vm1643_vm3, 0.0, %v1659_v28  ;;  %v1642_v32 = vsel %vm1627_vm4, inf, %v1641_v29 }
 0x412   :  { %v1661_v33 = vsel %vm1646_vm5, inf, %v1660_v30 }
 0x413   :  { %v67_v17 = vadd.f32 %v1661_v33, %v1642_v32 }
 0x415   :  { %v68_v34 = vmul.f32 0.5, %v67_v17 }
 0x417   :  { %v70_v20 = vmul.f32 %v69_v35, %v68_v34 }
 0x4d1   :  { %v1269_v37 = vpop.f32.mrb[10].mxu1 }
 0x4d2   :  { %v1270_v1 = vadd.f32 %v1269_v37, %v1199_v36  ;;  %v1548_v38 = vpop.f32.mrb[11].mxu1 }
 0x4d4   :  { %v1273_v39 = vmul.f32 %v1270_v1, %v70_v20 }
 0x4d6   :  { %1274 = vst [vmem:[%s2241_s11] sm:$0x1] %v1273_v39 }

</bundles_post_ra>
